<compile_context>
chip_gen: v6e
topology: v6e:2x2x1
jax: 0.10.0
libtpu: 0.0.40
codegen_flags: <defaults>
</compile_context>

<pallas_src>
import functools
import math

import jax
import jax.numpy as jnp
from jax.experimental import pallas as pl
from jax.experimental.pallas import tpu as pltpu

_LANE = 128
_SMALL_CALL_BYTES = 1 << 19  # below this, XLA's fused broadcast-add wins


# ---------------------------------------------------------------------------
# Kernel: (TS, Dl) tile add, f32 accumulate, store in the activation dtype
# ---------------------------------------------------------------------------
def _add_pe_kernel(x_ref, pe_ref, o_ref):
    # x_ref / o_ref: (TS, Dl) tile of the activation (batch dim squeezed away)
    # pe_ref:        (TS, Dl) float32 tile of the positional-encoding table
    o_ref[...] = (x_ref[...].astype(jnp.float32) + pe_ref[...]).astype(o_ref.dtype)


# ---------------------------------------------------------------------------
# Sinusoidal PE buffer — same formula as the torch register_buffer
# ---------------------------------------------------------------------------
def make_pe_buffer(d_model, max_len=5000):
    position = jnp.arange(max_len, dtype=jnp.float32)[:, None]
    div_term = jnp.exp(
        jnp.arange(0, d_model, 2, dtype=jnp.float32) * (-math.log(10000.0) / d_model)
    )
    pe = jnp.zeros((max_len, d_model), jnp.float32)
    pe = pe.at[:, 0::2].set(jnp.sin(position * div_term))
    pe = pe.at[:, 1::2].set(jnp.cos(position * div_term)[:, : d_model // 2])
    return pe


# ---------------------------------------------------------------------------
# forward(x) = x + pe[:x.shape[1]]   (output keeps x.dtype)
# ---------------------------------------------------------------------------
@functools.partial(
    jax.jit, static_argnames=("block_seq", "force_pallas", "vmem_budget_bytes")
)
def positional_encoding(x, pe, *, block_seq=512, force_pallas=False,
                        vmem_budget_bytes=24 * 1024 * 1024):
    B, S, D = x.shape
    itemsize = jnp.dtype(x.dtype).itemsize

    # Tiny calls: pallas_call dispatch + per-step overhead dominates; XLA's
    # fused broadcast-add is optimal. (The test below forces the Pallas path.)
    total_bytes = 2 * B * S * D * itemsize + S * D * 4
    if (not force_pallas) and total_bytes < _SMALL_CALL_BYTES:
        return (x.astype(jnp.float32) + pe[None, :S, :]).astype(x.dtype)

    # Lane-density: if d_model < 128, fold k = 128 // D consecutive sequence
    # rows into the lane dim (pure view reshape; the add stays elementwise-
    # consistent because pe is reshaped identically). The tiny pe[:S] slice this
    # needs is << activation traffic and buys unmasked, lane-dense stores.
    S2, D2, fold = S, D, 1
    if D < _LANE and _LANE % D == 0 and S % (_LANE // D) == 0:
        fold = _LANE // D
        S2, D2 = S // fold, D * fold
        x_in = x.reshape(B, S2, D2)
        pe_in = pe[:S, :].reshape(S2, D2)
    else:
        x_in = x
        pe_in = pe  # full buffer: the BlockSpec index_map slices rows [0, S) for free

    # Sequence-tile size: ~block_seq rows, capped so double-buffered
    # (x-in + x-out + f32 pe) tiles fit the VMEM budget (v7x: 64 MiB total,
    # 32 MiB default scoped -> 24 MiB leaves headroom).
    bytes_per_row = D2 * (2 * 2 * itemsize + 2 * 4)
    max_rows = max(8, (vmem_budget_bytes // bytes_per_row) // 8 * 8)
    ts = min(block_seq, max_rows)
    if S2 <= ts:
        ts = S2  # full extent always satisfies the (8, 128) block rule
    n_s = pl.cdiv(S2, ts)

    out = pl.pallas_call(
        _add_pe_kernel,
        # seq tiles OUTER, batch INNER: the PE tile's block index is constant
        # across consecutive grid steps, so it is fetched once per seq tile.
        grid=(n_s, B),
        in_specs=[
            pl.BlockSpec((pl.Squeezed(), ts, D2), lambda si, b: (b, si, 0)),
            pl.BlockSpec((ts, D2), lambda si, b: (si, 0)),
        ],
        out_specs=pl.BlockSpec((pl.Squeezed(), ts, D2), lambda si, b: (b, si, 0)),
        out_shape=jax.ShapeDtypeStruct((B, S2, D2), x.dtype),
        compiler_params=pltpu.CompilerParams(
            dimension_semantics=("parallel", "parallel"),
        ),
        cost_estimate=pl.CostEstimate(
            flops=B * S2 * D2,
            transcendentals=0,
            bytes_accessed=2 * B * S2 * D2 * itemsize + S2 * D2 * 4,
        ),
    )(x_in, pe_in)

    return out.reshape(B, S, D) if fold > 1 else out


# ---------------------------------------------------------------------------
if __name__ == "__main__":
    MAX_LEN = 5000  # same default as the PyTorch module

    # --- small shapes consistent with the module: batch=2, seq=8, d_model=32 ---
    B, S, D = 2, 8, 32
    key = jax.random.PRNGKey(0)
    x = jax.random.normal(key, (B, S, D), jnp.float32)
    pe = make_pe_buffer(D, MAX_LEN)
    ref = x + pe[None, :S, :]

    # Force the Pallas path so the kernel itself is exercised at the test shape
    # (it also exercises the lane-folding path since D=32 < 128).
    y = positional_encoding(x, pe, force_pallas=True)
    jax.block_until_ready(y)
    assert y.shape == (B, S, D) and y.dtype == x.dtype
    assert bool(jnp.all(jnp.isfinite(y)))
    assert bool(jnp.allclose(y, ref, atol=1e-6, rtol=1e-6))

    # Default wrapper (tiny shapes take the XLA fast path) must agree too.
    y_auto = positional_encoding(x, pe)
    jax.block_until_ready(y_auto)
    assert bool(jnp.allclose(y_auto, ref, atol=1e-6, rtol=1e-6))

    # --- larger shape: exercises the seq-tiled, no-fold path (D >= 128) ---
    B2, S2, D2 = 2, 1024, 256
    x2 = jax.random.normal(jax.random.PRNGKey(1), (B2, S2, D2), jnp.float32)
    pe2 = make_pe_buffer(D2, MAX_LEN)
    y2 = positional_encoding(x2, pe2)
    jax.block_until_ready(y2)
    ref2 = x2 + pe2[None, :S2, :]
    assert bool(jnp.allclose(y2, ref2, atol=1e-6, rtol=1e-6))

    # --- bf16 activations keep their dtype (halves HBM traffic vs f32 upcast) ---
    xb = x2.astype(jnp.bfloat16)
    yb = positional_encoding(xb, pe2)
    jax.block_until_ready(yb)
    assert yb.dtype == jnp.bfloat16
    refb = (xb.astype(jnp.float32) + pe2[None, :S2, :]).astype(jnp.bfloat16)
    assert bool(jnp.allclose(yb.astype(jnp.float32), refb.astype(jnp.float32),
                             atol=1e-2, rtol=1e-2))

    print("KERNEL_OK")
</pallas_src>

<mosaic_0001>
module attributes {stable_mosaic.version = 11 : i64} {
  func.func @_add_pe_kernel(%arg0: i32, %arg1: i32, %arg2: memref<1x2x128xf32, #tpu.memory_space<vmem>>, %arg3: memref<2x128xf32, #tpu.memory_space<vmem>>, %arg4: memref<1x2x128xf32, #tpu.memory_space<vmem>>) attributes {dimension_semantics = [#tpu.dimension_semantics<parallel>, #tpu.dimension_semantics<parallel>], iteration_bounds = array<i64: 1, 2>, scalar_prefetch = 0 : i64, scratch_operands = 0 : i64, tpu.core_type = #tpu.core_type<tc>, window_params = [{transform_indices = @transform_0, window_bounds = array<i64: 1, 2, 128>}, {transform_indices = @transform_1, window_bounds = array<i64: 2, 128>}, {transform_indices = @transform_2, window_bounds = array<i64: 1, 2, 128>}]} {
    %c0 = arith.constant 0 : index
    %c0_0 = arith.constant 0 : index
    %c0_1 = arith.constant 0 : index
    %0 = vector.load %arg2[%c0, %c0_0, %c0_1] : memref<1x2x128xf32, #tpu.memory_space<vmem>>, vector<1x2x128xf32>
    %1 = vector.shape_cast %0 : vector<1x2x128xf32> to vector<2x128xf32>
    %c0_2 = arith.constant 0 : index
    %c0_3 = arith.constant 0 : index
    %2 = vector.load %arg3[%c0_2, %c0_3] : memref<2x128xf32, #tpu.memory_space<vmem>>, vector<2x128xf32>
    %3 = arith.addf %1, %2 : vector<2x128xf32>
    %c0_4 = arith.constant 0 : index
    %c0_5 = arith.constant 0 : index
    %c0_6 = arith.constant 0 : index
    %4 = vector.load %arg4[%c0_4, %c0_5, %c0_6] : memref<1x2x128xf32, #tpu.memory_space<vmem>>, vector<1x2x128xf32>
    %5 = vector.shape_cast %4 : vector<1x2x128xf32> to vector<2x128xf32>
    %6 = vector.shape_cast %3 : vector<2x128xf32> to vector<1x2x128xf32>
    tpu.vector_store %arg4[%c0_4, %c0_5, %c0_6], %6 {strides = array<i32>} : memref<1x2x128xf32, #tpu.memory_space<vmem>>, vector<1x2x128xf32>,
    return
  }
  func.func @transform_0(%arg0: i32, %arg1: i32) -> (i32, i32, i32) {
    %c0_i32 = arith.constant 0 : i32
    %c0_i32_0 = arith.constant 0 : i32
    return %arg1, %arg0, %c0_i32 : i32, i32, i32
  }
  func.func @transform_1(%arg0: i32, %arg1: i32) -> (i32, i32) {
    %c0_i32 = arith.constant 0 : i32
    %c0_i32_0 = arith.constant 0 : i32
    return %arg0, %c0_i32 : i32, i32
  }
  func.func @transform_2(%arg0: i32, %arg1: i32) -> (i32, i32, i32) {
    %c0_i32 = arith.constant 0 : i32
    %c0_i32_0 = arith.constant 0 : i32
    return %arg1, %arg0, %c0_i32 : i32, i32, i32
  }
}

</mosaic_0001>

<bundles_post_ra>
// kernel: positional_encoding.1
= control target key start
LH: loop header
LB: loop body
LE: loop exit
PB: predicated region body
PF: predicated region fallthrough
CT: control target
= control target key end

     0   :  { %s354_s9 = smov 0   ;;  %s331_s10 = smov 0   ;;  %s368_s0 = inlined_call_operand.vmem [shape: f32[2,2,128], index: 0, kind: input, shape index: {}]   ;;  %s369_s1 = inlined_call_operand.vmem [shape: f32[2,128], index: 1, kind: input, shape index: {}]   ;;  %s370_s2 = inlined_call_operand.vmem [shape: f32[2,2,128], index: 2, kind: output, shape index: {}]  }
   0x1   :  { %s335_s11 = smov 0  }
   0x2 LB: > { %s21_s12 = sadd.s32 1, %s333_s10  ;;  %p286_p0 = scmp.ge.s32.totalorder %s337_s11, 1  ;;  %s337_s11 = sphi %s335_s11, %s12_s11   ;;  %s333_s10 = sphi %s331_s10, %s332_s10   ;;  %s329_s9 = sphi %s354_s9, %s371_s9  }
   0x3   : > { %p22_p1 = scmp.ge.s32.totalorder %s21_s12, 2  ;;  %p139_p2 = scmp.lt.s32.totalorder %s337_s11, 3 }
   0x5   : > { %s373_s12 = smov (%p22_p1, %s21_s12), 0  ;;  %p140_p3 = pnand %p286_p0, %p139_p2 }
   0x6   : > { %p169_p4 = scmp.lt.s32.totalorder (!%p140_p3), %s329_s9, 1 }
   0x7   : > { %143 = sbr.rel (%p140_p3) target bundleno = 19 (0x13), region = 28 }
   0xc   : > { %s375_s9 = smov (!%p169_p4, %s329_s9), 1  ;;  %v188_v0 = vld [vmem:[%s369_s1] sm:$0x3] }
   0xd   : > { %s287_s13 = sshll.u32 %s375_s9, 1 }
   0xe   : > { %s175_s18 = scalar_lea.vmem %s368_s0, %s287_s13  ;;  %s186_s21 = scalar_lea.vmem %s370_s2, %s287_s13 }
   0xf   : > { %v187_v1 = vld [vmem:[%s175_s18] sm:$0x3] }
  0x10   : > { %v189_v2 = vadd.f32 %v188_v0, %v187_v1 }
  0x12   : > { %190 = vst [vmem:[%s186_s21] sm:$0x3] %v189_v2 }
  0x13 PF: > { %s12_s11 = sadd.s32 1, %s337_s11   ;;  %s371_s9 = smov %s333_s10 }
  0x14   : > { %p9_p5 = scmp.ge.s32.totalorder %s12_s11, 4   ;;  %s332_s10 = smov %s373_s12  }
  0x16   :  { %11 = sbr.rel (!%p9_p5) target bundleno = 2 (0x2), region = 61 }

</bundles_post_ra>
